<compile_context>
chip_gen: v6e
topology: v6e:2x2x1
jax: 0.10.0
libtpu: 0.0.40
codegen_flags: <defaults>
</compile_context>

<pallas_src>
import jax
import jax.numpy as jnp
from jax.experimental import pallas as pl
from jax.experimental.pallas import tpu as pltpu


def _identity_kernel(x_ref, o_ref):
    # The entire "forward" of PassLayer: pass the tile through untouched.
    o_ref[...] = x_ref[...]


_WHOLE_ARRAY_BYTES = 1 * 1024 * 1024          # single-block path below this
_LANE_WIDTHS = (4096, 2048, 1024, 512, 256, 128)


def _sublane_multiple(dtype) -> int:
    """Minimum sublane tile for this dtype: 8 (32-bit), 16 (16-bit), 32 (8-bit)."""
    bits = jnp.dtype(dtype).itemsize * 8
    return max(8, 256 // bits)


def _round_up(n: int, m: int) -> int:
    return -(-n // m) * m


def _tile_target_bytes() -> int:
    """Generation-aware per-tile byte target for the pipelined copy."""
    try:
        kind = jax.devices()[0].device_kind.lower()
    except Exception:  # pragma: no cover - defensive
        kind = ""
    if "v7" in kind:
        return 4 * 1024 * 1024   # 4 MiB: fewer grid steps vs 3.2 TB/s HBM
    return 2 * 1024 * 1024       # 2 MiB: ~85% roofline on v5e/v6e, fits 16 MiB scoped VMEM


def _fold_lane_dense(x: jax.Array) -> jax.Array:
    """Flatten and fold to (N/L, L) with L a large multiple of 128 if possible.

    Contiguous reshape -> no data movement; fallback keeps the original
    trailing dim so the (8,128) block rule is satisfied via the full-extent
    exception.
    """
    n = x.size
    lane = next((L for L in _LANE_WIDTHS if n % L == 0), None)
    if lane is not None:
        return x.reshape(n // lane, lane)
    last = x.shape[-1] if x.ndim >= 1 else 1
    return x.reshape(n // last, last)


def _pass_one_whole(x: jax.Array) -> jax.Array:
    """Small arrays: one lane-dense whole-array VMEM block, no grid."""
    x2d = _fold_lane_dense(x)
    nbytes = x.size * x.dtype.itemsize
    out2d = pl.pallas_call(
        _identity_kernel,
        out_shape=jax.ShapeDtypeStruct(x2d.shape, x2d.dtype),
        cost_estimate=pl.CostEstimate(
            flops=0, transcendentals=0, bytes_accessed=2 * nbytes),
    )(x2d)
    return out2d.reshape(x.shape)


def _tiled_copy_2d(x2d: jax.Array, tile_target_bytes: int) -> jax.Array:
    """Pipelined 2-D tiled copy of a (rows, cols) array."""
    rows, cols = x2d.shape
    item = x2d.dtype.itemsize
    sub = _sublane_multiple(x2d.dtype)

    if cols * item * sub <= tile_target_bytes:
        # Full lane extent per block (also covers cols not multiple of 128),
        # grow the sublane axis up to the tile budget.
        tile_cols = cols
        tile_rows = max(sub, (tile_target_bytes // (cols * item)) // sub * sub)
        tile_rows = min(tile_rows, _round_up(rows, sub))
    else:
        # A single (sub, cols) stripe exceeds the budget (huge trailing dim /
        # large 1-D input): tile the lane axis too in multiples of 128.
        tile_rows = sub
        tile_cols = max(128, (tile_target_bytes // (sub * item)) // 128 * 128)
        tile_cols = min(tile_cols, _round_up(cols, 128))

    grid = (pl.cdiv(rows, tile_rows), pl.cdiv(cols, tile_cols))
    nbytes = rows * cols * item

    return pl.pallas_call(
        _identity_kernel,
        out_shape=jax.ShapeDtypeStruct((rows, cols), x2d.dtype),
        grid_spec=pltpu.PrefetchScalarGridSpec(
            num_scalar_prefetch=0,
            grid=grid,
            in_specs=[pl.BlockSpec((tile_rows, tile_cols), lambda i, j: (i, j))],
            out_specs=pl.BlockSpec((tile_rows, tile_cols), lambda i, j: (i, j)),
        ),
        cost_estimate=pl.CostEstimate(
            flops=0, transcendentals=0, bytes_accessed=2 * nbytes),
        compiler_params=pltpu.CompilerParams(
            dimension_semantics=("parallel", "parallel"),
        ),
    )(x2d)


def _pass_one_tiled(x: jax.Array, tile_target_bytes: int | None = None) -> jax.Array:
    if tile_target_bytes is None:
        tile_target_bytes = _tile_target_bytes()
    x2d = _fold_lane_dense(x)
    out2d = _tiled_copy_2d(x2d, tile_target_bytes)
    return out2d.reshape(x.shape)


def _pass_one(x: jax.Array) -> jax.Array:
    if x.ndim == 0 or x.size == 0:
        return x  # nothing to DMA
    nbytes = x.size * x.dtype.itemsize
    if nbytes <= _WHOLE_ARRAY_BYTES:
        return _pass_one_whole(x)
    return _pass_one_tiled(x)


def pass_layer(*args, materialize: bool = True):
    """JAX/Pallas equivalent of PassLayer.forward: returns args unchanged.

    PassLayer is a semantic no-op; with `materialize=False` the inputs are
    returned directly (zero HBM traffic — the true optimum).  The default
    (`materialize=True`) round-trips every array through the Pallas identity
    kernel so the module is realized as an actual TPU op.
    """
    if not materialize:
        return tuple(args)
    return tuple(_pass_one(a) for a in args)


if __name__ == "__main__":
    key = jax.random.PRNGKey(0)
    k1, k2 = jax.random.split(key)
    # Small shapes consistent with a generic forward pass (NCHW + a seq tensor).
    x = jax.random.normal(k1, (2, 4, 16, 16), dtype=jnp.float32)
    y = jax.random.normal(k2, (2, 8, 32), dtype=jnp.float32)

    outs = pass_layer(x, y)
    outs = jax.block_until_ready(outs)

    assert len(outs) == 2
    assert outs[0].shape == x.shape and outs[0].dtype == x.dtype
    assert outs[1].shape == y.shape and outs[1].dtype == y.dtype
    assert bool(jnp.all(outs[0] == x))
    assert bool(jnp.all(outs[1] == y))

    # Exercise the tiled code paths on small data by forcing a tiny per-tile
    # budget: lane-dense fold + 2-D grid with lane-axis tiling and rows < sub.
    z = _pass_one_tiled(x, tile_target_bytes=4096)
    z = jax.block_until_ready(z)
    assert z.shape == x.shape and z.dtype == x.dtype
    assert bool(jnp.all(z == x))

    # Non-multiple-of-128 total size -> trailing-dim fallback layout.
    w_in = jax.random.normal(k1, (5, 7, 3), dtype=jnp.float32)
    w = _pass_one_tiled(w_in, tile_target_bytes=4096)
    w = jax.block_until_ready(w)
    assert w.shape == w_in.shape and bool(jnp.all(w == w_in))

    # True no-op short-circuit.
    s = pass_layer(x, y, materialize=False)
    assert s[0] is x and s[1] is y

    print("KERNEL_OK")
</pallas_src>

<mosaic_0001>
module attributes {stable_mosaic.version = 11 : i64} {
  func.func @_identity_kernel(%arg0: memref<1x2048xf32, #tpu.memory_space<vmem>>, %arg1: memref<1x2048xf32, #tpu.memory_space<vmem>>) attributes {dimension_semantics = [], scalar_prefetch = 0 : i64, scratch_operands = 0 : i64, tpu.core_type = #tpu.core_type<tc>} {
    %c0 = arith.constant 0 : index
    %c0_0 = arith.constant 0 : index
    %0 = vector.load %arg0[%c0, %c0_0] : memref<1x2048xf32, #tpu.memory_space<vmem>>, vector<1x2048xf32>
    %c0_1 = arith.constant 0 : index
    %c0_2 = arith.constant 0 : index
    %1 = vector.load %arg1[%c0_1, %c0_2] : memref<1x2048xf32, #tpu.memory_space<vmem>>, vector<1x2048xf32>
    tpu.vector_store %arg1[%c0_1, %c0_2], %0 {strides = array<i32>} : memref<1x2048xf32, #tpu.memory_space<vmem>>, vector<1x2048xf32>,
    return
  }
}

</mosaic_0001>

<bundles_post_ra>
// kernel: tpu_custom_call.1
= control target key start
LH: loop header
LB: loop body
LE: loop exit
PB: predicated region body
PF: predicated region fallthrough
CT: control target
= control target key end

     0   :  { %6 = vsyncpa [#allocation3], 0  ;;  %s104_s0 = inlined_call_operand.hbm [shape: f32[1,2048], index: 0, kind: input, shape index: {}]   ;;  %s105_s1 = inlined_call_operand.hbm [shape: f32[1,2048], index: 1, kind: output, shape index: {}]  }
   0x1   :  { %7 = vsyncpa [#allocation4], 0  ;;  %s86_s6 = smov [#allocation2]  }
   0x2   :  { %s14_s7 = sshll.u32 %s86_s6, 4  ;;  %s15_s7 = int_to_ptr.vmem [resolvable:$true] %s14_s7 }
   0x3   :  { %s50_s8 = scalar_lea.vmem %s15_s7, 256  ;;  %p55_p1 = scmp.lt.s32.totalorder %s15_s7, %s15_s7 }
   0x4   :  { %p51_p0 = scmp.ne.s32.totalorder %s15_s7, %s50_s8  ;;  %p56_p2 = scmp.lt.s32.totalorder %s50_s8, %s50_s8 }
   0x6   :  { %p57_p3 = por %p56_p2, %p55_p1 }
   0x8   :  { %p58_p4 = pnand %p57_p3, %p51_p0 }
   0xa   :  { %61 = shalt.err (!%p58_p4)
}
   0xb   :  { %17 = dma.hbm_to_vmem [thread:$0]  %s104_s0, 256, %s15_s7, [#allocation3]  }
   0xc   :  { %82 = dma.done.wait [#allocation3], 256  }
   0xd   :  { %83 = vsyncadd [#allocation3], 4294967040  ;;  %s87_s11 = smov [#allocation5]   ;;  %v21_v0 = vld [vmem:[#allocation2] sm:$0xff]  ;;  %v22_v1 = vld [vmem:[#allocation2 + $0x8] sm:$0xff] }
   0xe   :  { %s31_s12 = sshll.u32 %s87_s11, 4  ;;  %23 = vst [vmem:[#allocation5] sm:$0xff] %v21_v0  ;;  %24 = vst [vmem:[#allocation5 + $0x8] sm:$0xff] %v22_v1  ;;  %s32_s12 = int_to_ptr.vmem [resolvable:$true] %s31_s12 }
   0xf   :  { %s62_s13 = scalar_lea.vmem %s32_s12, 256  ;;  %p67_p6 = scmp.lt.s32.totalorder %s32_s12, %s32_s12 }
  0x10   :  { %p63_p5 = scmp.ne.s32.totalorder %s32_s12, %s62_s13  ;;  %p68_p7 = scmp.lt.s32.totalorder %s62_s13, %s62_s13 }
  0x12   :  { %p69_p8 = por %p68_p7, %p67_p6 }
  0x14   :  { %p70_p9 = pnand %p69_p8, %p63_p5 }
  0x16   :  { %73 = shalt.err (!%p70_p9)
}
  0x17   :  { %34 = dma.vmem_to_hbm [thread:$0]  %s32_s12, 256, %s105_s1, [#allocation4]  }
  0x18   :  { %84 = dma.done.wait [#allocation4], 256  }
  0x19   :  { %85 = vsyncadd [#allocation4], 4294967040 }
  0x1a   :  { %38 = vsyncpa [#allocation3], 1 }
  0x1b   :  { %39 = vsyncpa [#allocation4], 1 }

</bundles_post_ra>
